<compile_context>
chip_gen: v5e
topology: v5e:2x2
jax: 0.10.0
libtpu: 0.0.40
codegen_flags: <defaults>
</compile_context>

<pallas_src>
import numpy as np
import jax
import jax.numpy as jnp
from jax import lax
from jax.experimental import pallas as pl
from jax.experimental.pallas import tpu as pltpu


def _spd_logm_kernel(u_ref, logs_ref, out_ref):
    # u_ref:    (TB, N, N)  eigenvectors of TB SPD matrices
    # logs_ref: (TB, 1, N)  log-eigenvalues
    # out_ref:  (TB, N, N)  matrix logarithms  U @ diag(log s) @ U^T
    u = u_ref[...]                       # (TB, N, N)
    scaled = u * logs_ref[...]           # (TB, N, N)  == U @ diag(log s)
    # Batched contraction over the last dims (no explicit transpose):
    #   logm[b, i, k] = sum_j scaled[b, i, j] * u[b, k, j]
    logm = lax.dot_general(
        scaled, u,
        dimension_numbers=(((2,), (2,)), ((0,), (0,))),
        preferred_element_type=jnp.float32,
    )
    out_ref[...] = logm.astype(out_ref.dtype)


def _pick_block_batch(b: int, n: int, tb_target: int) -> int:
    """Largest per-step batch TB <= tb_target that fits a ~40 MiB VMEM budget."""
    lane = max(128, n)                       # lane-padded last dim
    sub = ((n + 7) // 8) * 8                 # sublane-padded second-last dim
    per_matrix = 2 * (2 * sub * lane * 4 + 8 * lane * 4)   # dbl-buffered u/out/logs
    budget = 40 << 20
    tb_max = max(1, budget // max(1, per_matrix))
    return int(max(1, min(tb_target, b, tb_max)))


def spd_tangent_space(x: jax.Array, vectorize: bool = True,
                      tb_target: int = 128) -> jax.Array:
    """x: (B, N, N) batch of SPD matrices. Returns (B, N*(N+1)/2) if vectorize."""
    b, n, _ = x.shape
    x = x.astype(jnp.float32)

    # Glue: eigendecomposition (== SVD for SPD matrices) in plain JAX.
    # TODO(synk): the iterative eigen/SVD solver has no clean Pallas equivalent.
    w, u = jnp.linalg.eigh(x)                              # w: (B, N), u: (B, N, N)
    w = jnp.maximum(w, jnp.finfo(jnp.float32).tiny)        # guard log() near singular
    logs = jnp.log(w).astype(jnp.float32).reshape(b, 1, n)
    u = u.astype(jnp.float32)

    # Batch TB matrices per grid step; pad the batch to a multiple of TB.
    tb = _pick_block_batch(b, n, tb_target)
    b_pad = pl.cdiv(b, tb) * tb
    if b_pad != b:
        pad = b_pad - b
        u = jnp.pad(u, ((0, pad), (0, 0), (0, 0)))         # zero matrices -> logm == 0
        logs = jnp.pad(logs, ((0, pad), (0, 0), (0, 0)))

    # VMEM limit: lane-padded, double-buffered in/out blocks plus headroom.
    lane = max(128, n)
    sub = ((n + 7) // 8) * 8
    block_bytes = tb * sub * lane * 4                      # u block / out block
    logs_bytes = tb * 8 * lane * 4
    vmem_bytes = int(2 * (2 * block_bytes + logs_bytes) + (4 << 20))
    vmem_bytes = int(min(max(vmem_bytes, 16 << 20), 64 << 20))

    logm = pl.pallas_call(
        _spd_logm_kernel,
        out_shape=jax.ShapeDtypeStruct((b_pad, n, n), jnp.float32),
        grid_spec=pltpu.PrefetchScalarGridSpec(
            num_scalar_prefetch=0,
            grid=(b_pad // tb,),
            in_specs=[
                pl.BlockSpec((tb, n, n), lambda i: (i, 0, 0)),
                pl.BlockSpec((tb, 1, n), lambda i: (i, 0, 0)),
            ],
            out_specs=pl.BlockSpec((tb, n, n), lambda i: (i, 0, 0)),
        ),
        compiler_params=pltpu.CompilerParams(
            dimension_semantics=("parallel",),
            vmem_limit_bytes=vmem_bytes,
        ),
    )(u, logs)

    logm = logm[:b]
    if vectorize:
        # SPDVectorize: upper-triangular gather, same order as torch.triu_indices.
        row_idx, col_idx = np.triu_indices(n)
        return logm[:, row_idx, col_idx]
    return logm


def _reference(x: jax.Array, vectorize: bool = True) -> jax.Array:
    """Plain-JAX reference matching the PyTorch forward."""
    w, u = jnp.linalg.eigh(x)
    logm = jnp.einsum("bij,bj,bkj->bik", u, jnp.log(w), u)
    if not vectorize:
        return logm
    row_idx, col_idx = np.triu_indices(x.shape[1])
    return logm[:, row_idx, col_idx]


if __name__ == "__main__":
    B, N = 8, 16
    key = jax.random.PRNGKey(0)
    a = jax.random.normal(key, (B, N, N), dtype=jnp.float32)
    # Well-conditioned SPD inputs: A @ A^T + N * I
    x = jnp.einsum("bij,bkj->bik", a, a) + N * jnp.eye(N, dtype=jnp.float32)[None]

    ref = _reference(x, vectorize=True)

    # Default tiling (single grid step here).
    out = jax.block_until_ready(spd_tangent_space(x, vectorize=True))
    assert out.shape == (B, N * (N + 1) // 2), out.shape
    assert jnp.allclose(out, ref, atol=1e-4, rtol=1e-4), "mismatch vs reference"

    # Exercise multi-step grid + batch padding (B=8 -> padded to 9 with tb=3).
    out2 = jax.block_until_ready(spd_tangent_space(x, vectorize=True, tb_target=3))
    assert jnp.allclose(out2, ref, atol=1e-4, rtol=1e-4), "mismatch (padded path)"

    # vectorize=False path returns the full matrix logarithm.
    full = jax.block_until_ready(spd_tangent_space(x, vectorize=False))
    assert jnp.allclose(full, _reference(x, vectorize=False),
                        atol=1e-4, rtol=1e-4), "mismatch (full logm)"

    print("KERNEL_OK")
</pallas_src>

<mosaic_0001>
module attributes {stable_mosaic.version = 11 : i64} {
  func.func @_spd_logm_kernel(%arg0: i32, %arg1: memref<8x16x16xf32, #tpu.memory_space<vmem>>, %arg2: memref<8x1x16xf32, #tpu.memory_space<vmem>>, %arg3: memref<8x16x16xf32, #tpu.memory_space<vmem>>) attributes {dimension_semantics = [#tpu.dimension_semantics<parallel>], iteration_bounds = array<i64: 1>, scalar_prefetch = 0 : i64, scratch_operands = 0 : i64, tpu.core_type = #tpu.core_type<tc>, window_params = [{transform_indices = @transform_0, window_bounds = array<i64: 8, 16, 16>}, {transform_indices = @transform_1, window_bounds = array<i64: 8, 1, 16>}, {transform_indices = @transform_2, window_bounds = array<i64: 8, 16, 16>}]} {
    %c0 = arith.constant 0 : index
    %c0_0 = arith.constant 0 : index
    %c0_1 = arith.constant 0 : index
    %0 = vector.load %arg1[%c0, %c0_0, %c0_1] : memref<8x16x16xf32, #tpu.memory_space<vmem>>, vector<8x16x16xf32>
    %c0_2 = arith.constant 0 : index
    %c0_3 = arith.constant 0 : index
    %c0_4 = arith.constant 0 : index
    %1 = vector.load %arg2[%c0_2, %c0_3, %c0_4] : memref<8x1x16xf32, #tpu.memory_space<vmem>>, vector<8x1x16xf32>
    %2 = vector.broadcast %1 : vector<8x1x16xf32> to vector<8x16x16xf32>
    %3 = arith.mulf %0, %2 : vector<8x16x16xf32>
    %cst = arith.constant dense<0.000000e+00> : vector<8x16x16xf32>
    %4 = tpu.matmul %3, %0, %cst {dimension_numbers = #tpu.dot_dimension_numbers<[2], [2], [1], [1], [0, 0, 0, 1, 1, 1], [0], [0]>} : vector<8x16x16xf32>, vector<8x16x16xf32>, vector<8x16x16xf32> -> vector<8x16x16xf32>
    %c0_5 = arith.constant 0 : index
    %c0_6 = arith.constant 0 : index
    %c0_7 = arith.constant 0 : index
    %5 = vector.load %arg3[%c0_5, %c0_6, %c0_7] : memref<8x16x16xf32, #tpu.memory_space<vmem>>, vector<8x16x16xf32>
    tpu.vector_store %arg3[%c0_5, %c0_6, %c0_7], %4 {strides = array<i32>} : memref<8x16x16xf32, #tpu.memory_space<vmem>>, vector<8x16x16xf32>,
    return
  }
  func.func @transform_0(%arg0: i32) -> (i32, i32, i32) {
    %c0_i32 = arith.constant 0 : i32
    %c0_i32_0 = arith.constant 0 : i32
    %c0_i32_1 = arith.constant 0 : i32
    return %arg0, %c0_i32, %c0_i32_0 : i32, i32, i32
  }
  func.func @transform_1(%arg0: i32) -> (i32, i32, i32) {
    %c0_i32 = arith.constant 0 : i32
    %c0_i32_0 = arith.constant 0 : i32
    %c0_i32_1 = arith.constant 0 : i32
    return %arg0, %c0_i32, %c0_i32_0 : i32, i32, i32
  }
  func.func @transform_2(%arg0: i32) -> (i32, i32, i32) {
    %c0_i32 = arith.constant 0 : i32
    %c0_i32_0 = arith.constant 0 : i32
    %c0_i32_1 = arith.constant 0 : i32
    return %arg0, %c0_i32, %c0_i32_0 : i32, i32, i32
  }
}

</mosaic_0001>

<bundles_post_ra>
// kernel: tpu_custom_call.1
= control target key start
LH: loop header
LB: loop body
LE: loop exit
PB: predicated region body
PF: predicated region fallthrough
CT: control target
= control target key end

     0   :  { %7 = vsyncpa [#allocation3], 0  ;;  %s635_s0 = inlined_call_operand.hbm [shape: f32[8,16,16], index: 0, kind: input, shape index: {}]   ;;  %s636_s1 = inlined_call_operand.hbm [shape: f32[8,1,16], index: 1, kind: input, shape index: {}]   ;;  %s637_s2 = inlined_call_operand.hbm [shape: f32[8,16,16], index: 2, kind: output, shape index: {}]  }
   0x1   :  { %8 = vsyncpa [#allocation6], 0 }
   0x2   :  { %9 = vsyncpa [#allocation4], 0  ;;  %s14_s11 = sshll.u32 %s635_s0, 4  ;;  %s550_s12 = smov [#allocation2]   ;;  %s15_s11 = int_to_ptr.hbm [resolvable:$true] %s14_s11 }
   0x3   :  { %s16_s13 = sshll.u32 %s550_s12, 4  ;;  %s27_s16 = sshll.u32 %s636_s1, 4  ;;  %s17_s13 = int_to_ptr.vmem [resolvable:$true] %s16_s13  ;;  %s28_s16 = int_to_ptr.hbm [resolvable:$true] %s27_s16 }
   0x4   :  { %s551_s17 = smov 128   ;;  %s552_s18 = smov 8  }
   0x5   :  { %22 = dma.hbm_to_vmem [thread:$0]  %s15_s11, 2048, %s17_s13, [#allocation3], %s551_s17, %s551_s17, %s552_s18  }
   0x6   :  { %s553_s19 = smov [#allocation5]   ;;  %s554_s21 = smov 16  }
   0x7   :  { %s29_s20 = sshll.u32 %s553_s19, 4  ;;  %s555_s0 = smov 1   ;;  %s30_s20 = int_to_ptr.vmem [resolvable:$true] %s29_s20 }
   0x8   :  { %35 = dma.hbm_to_vmem [thread:$0]  %s28_s16, 128, %s30_s20, [#allocation6], %s554_s21, %s554_s21, %s555_s0  }
   0x9   :  { %544 = dma.done.wait [#allocation3], 2048  }
   0xa   :  { %545 = vsyncadd [#allocation3], 4294965248 }
   0xb   :  { %546 = dma.done.wait [#allocation6], 128  }
   0xc   :  { %547 = vsyncadd [#allocation6], 4294967168  ;;  %vm108_vm0 = vcmask 130048   ;;  %v49_v0 = vld [vmem:[#allocation2 + $0x28] sm:$0xff]  ;;  %v464_v1 = vld [vmem:[#allocation5 + $0x2] ss:$0 sm:$0xff] }
   0xd   :  { %433 = vmatpush.xpose.msk.msra.mxu2 %vm108_vm0, %v49_v0  ;;  %v51_v2 = vld [vmem:[#allocation2 + $0x38] sm:$0xff]  ;;  %v465_v3 = vld [vmem:[#allocation5 + $0x3] ss:$0 sm:$0xff]  ;;  %v50_v5 = vld [vmem:[#allocation2 + $0x30] sm:$0xff]  ;;  %v97_v24 = vmul.f32 %v464_v1, %v49_v0  ;;  %s556_s1 = smov [#allocation7]   ;;  %s411_s25 = sshll.u32 %s637_s2, 4  ;;  %s412_s25 = int_to_ptr.hbm [resolvable:$true] %s411_s25 }
   0xe   :  { %437 = vmatpush.xpose.msk.msra.mxu3 %vm108_vm0, %v51_v2  ;;  %v48_v4 = vld [vmem:[#allocation2 + $0x20] sm:$0xff]  ;;  %v45_v6 = vld [vmem:[#allocation2 + $0x8] sm:$0xff]  ;;  %v47_v8 = vld [vmem:[#allocation2 + $0x18] sm:$0xff]  ;;  %v98_v12 = vmul.f32 %v465_v3, %v50_v5  ;;  %v99_v25 = vmul.f32 %v465_v3, %v51_v2  ;;  %s409_s22 = sshll.u32 %s556_s1, 4  ;;  %s410_s22 = int_to_ptr.vmem [resolvable:$true] %s409_s22 }
   0xf   :  { %v466_v7 = vld [vmem:[#allocation5] ss:$0 sm:$0xff]  ;;  %425 = vmatpush.xpose.msk.msra.mxu0 %vm108_vm0, %v45_v6  ;;  %v96_v9 = vmul.f32 %v464_v1, %v48_v4  ;;  %v467_v10 = vld [vmem:[#allocation5 + $0x1] ss:$0 sm:$0xff]  ;;  %429 = vmatpush.xpose.msk.msra.mxu1 %vm108_vm0, %v47_v8  ;;  %v57_v11 = vld [vmem:[#allocation2 + $0x68] sm:$0xff] }
  0x10   :  { %v59_v13 = vld [vmem:[#allocation2 + $0x78] sm:$0xff]  ;;  %v44_v14 = vld [vmem:[#allocation2] sm:$0xff]  ;;  %v46_v16 = vld [vmem:[#allocation2 + $0x10] sm:$0xff]  ;;  %v93_v26 = vmul.f32 %v466_v7, %v45_v6  ;;  %v95_v27 = vmul.f32 %v467_v10, %v47_v8 }
  0x11   :  { %434 = vmatpush.xpose.msk.msra.mxu2 %vm108_vm0, %v48_v4  ;;  %v92_v15 = vmul.f32 %v466_v7, %v44_v14  ;;  %v53_v17 = vld [vmem:[#allocation2 + $0x48] sm:$0xff]  ;;  %v94_v18 = vmul.f32 %v467_v10, %v46_v16  ;;  %v55_v19 = vld [vmem:[#allocation2 + $0x58] sm:$0xff]  ;;  %v56_v20 = vld [vmem:[#allocation2 + $0x60] sm:$0xff] }
  0x12   :  { %438 = vmatpush.xpose.msk.msra.mxu3 %vm108_vm0, %v50_v5  ;;  %v58_v21 = vld [vmem:[#allocation2 + $0x70] sm:$0xff]  ;;  %v52_v22 = vld [vmem:[#allocation2 + $0x40] sm:$0xff] }
  0x13   :  { %426 = vmatpush.xpose.msk.msra.mxu0 %vm108_vm0, %v44_v14  ;;  %430 = vmatpush.xpose.msk.msra.mxu1 %vm108_vm0, %v46_v16  ;;  %v54_v23 = vld [vmem:[#allocation2 + $0x50] sm:$0xff]  ;;  %v468_v28 = vld [vmem:[#allocation5 + $0x6] ss:$0 sm:$0xff]  ;;  %v469_v29 = vld [vmem:[#allocation5 + $0x7] ss:$0 sm:$0xff] }
  0x14   :  { %435 = vmatmul.msk.f32.vlgmr.msra.gmra.mxu2 %vm108_vm0, %v96_v9  ;;  %v470_v30 = vld [vmem:[#allocation5 + $0x4] ss:$0 sm:$0xff]  ;;  %v471_v31 = vld [vmem:[#allocation5 + $0x5] ss:$0 sm:$0xff]  ;;  %v104_v32 = vmul.f32 %v468_v28, %v56_v20  ;;  %v106_v33 = vmul.f32 %v469_v29, %v58_v21  ;;  %v105_v36 = vmul.f32 %v468_v28, %v57_v11  ;;  %v107_v37 = vmul.f32 %v469_v29, %v59_v13 }
  0x15   :  { %449 = vmatpush.xpose.msk.msrb.mxu2 %vm108_vm0, %v57_v11  ;;  %439 = vmatmul.msk.f32.vlgmr.msra.gmra.mxu3 %vm108_vm0, %v98_v12  ;;  %v100_v34 = vmul.f32 %v470_v30, %v52_v22  ;;  %v102_v35 = vmul.f32 %v471_v31, %v54_v23  ;;  %v101_v38 = vmul.f32 %v470_v30, %v53_v17 }
  0x16   :  { %453 = vmatpush.xpose.msk.msrb.mxu3 %vm108_vm0, %v59_v13  ;;  %427 = vmatmul.msk.f32.vlgmr.msra.gmra.mxu0 %vm108_vm0, %v92_v15  ;;  %v103_v39 = vmul.f32 %v471_v31, %v55_v19 }
  0x17   :  { %441 = vmatpush.xpose.msk.msrb.mxu0 %vm108_vm0, %v53_v17  ;;  %445 = vmatpush.xpose.msk.msrb.mxu1 %vm108_vm0, %v55_v19 }
  0x18   :  { %431 = vmatmul.msk.f32.vlgmr.msra.gmra.mxu1 %vm108_vm0, %v94_v18 }
  0x19   :  { %450 = vmatpush.xpose.msk.msrb.mxu2 %vm108_vm0, %v56_v20 }
  0x1a   :  { %454 = vmatpush.xpose.msk.msrb.mxu3 %vm108_vm0, %v58_v21 }
  0x1b   :  { %442 = vmatpush.xpose.msk.msrb.mxu0 %vm108_vm0, %v52_v22  ;;  %446 = vmatpush.xpose.msk.msrb.mxu1 %vm108_vm0, %v54_v23 }
  0x1c   :  { %436 = vmatmul.msk.f32.gmra.mxu2 %vm108_vm0, %v97_v24 }
  0x1d   :  { %440 = vmatmul.msk.f32.gmra.mxu3 %vm108_vm0, %v99_v25 }
  0x1e   :  { %428 = vmatmul.msk.f32.gmra.mxu0 %vm108_vm0, %v93_v26 }
  0x20   :  { %432 = vmatmul.msk.f32.gmra.mxu1 %vm108_vm0, %v95_v27 }
  0x24   :  { %451 = vmatmul.msk.f32.vlgmr.msrb.gmra.mxu2 %vm108_vm0, %v104_v32 }
  0x25   :  { %455 = vmatmul.msk.f32.vlgmr.msrb.gmra.mxu3 %vm108_vm0, %v106_v33 }
  0x26   :  { %443 = vmatmul.msk.f32.vlgmr.msrb.gmra.mxu0 %vm108_vm0, %v100_v34 }
  0x28   :  { %447 = vmatmul.msk.f32.vlgmr.msrb.gmra.mxu1 %vm108_vm0, %v102_v35 }
  0x2c   :  { %452 = vmatmul.msk.f32.gmra.mxu2 %vm108_vm0, %v105_v36 }
  0x2d   :  { %456 = vmatmul.msk.f32.gmra.mxu3 %vm108_vm0, %v107_v37 }
  0x2e   :  { %444 = vmatmul.msk.f32.gmra.mxu0 %vm108_vm0, %v101_v38 }
  0x30   :  { %448 = vmatmul.msk.f32.gmra.mxu1 %vm108_vm0, %v103_v39 }
  0x93   :  { %v138_v40 = vpop.f32.mrf.mxu0 }
  0x94   :  { %389 = vst.msk [vmem:[#allocation7] sm:$0xff] %vm108_vm0, %v138_v40 }
  0x95   :  { %v173_v41 = vpop.f32.mrf.mxu1 }
  0x96   :  { %391 = vst.msk [vmem:[#allocation7 + $0x10] sm:$0xff] %vm108_vm0, %v173_v41 }
  0x97   :  { %v208_v42 = vpop.f32.mrf.mxu2 }
  0x98   :  { %393 = vst.msk [vmem:[#allocation7 + $0x20] sm:$0xff] %vm108_vm0, %v208_v42  ;;  %v243_v43 = vpop.f32.mrf.mxu3 }
  0x99   :  { %395 = vst.msk [vmem:[#allocation7 + $0x30] sm:$0xff] %vm108_vm0, %v243_v43 }
  0x9b   :  { %v141_v44 = vpop.f32.mrf.mxu0 }
  0x9c   :  { %390 = vst.msk [vmem:[#allocation7 + $0x8] sm:$0xff] %vm108_vm0, %v141_v44 }
  0x9d   :  { %v176_v45 = vpop.f32.mrf.mxu1 }
  0x9e   :  { %392 = vst.msk [vmem:[#allocation7 + $0x18] sm:$0xff] %vm108_vm0, %v176_v45 }
  0x9f   :  { %v211_v46 = vpop.f32.mrf.mxu2 }
  0xa0   :  { %394 = vst.msk [vmem:[#allocation7 + $0x28] sm:$0xff] %vm108_vm0, %v211_v46  ;;  %v246_v47 = vpop.f32.mrf.mxu3 }
  0xa1   :  { %396 = vst.msk [vmem:[#allocation7 + $0x38] sm:$0xff] %vm108_vm0, %v246_v47 }
  0xa3   :  { %v278_v48 = vpop.f32.mrf.mxu0 }
  0xa4   :  { %397 = vst.msk [vmem:[#allocation7 + $0x40] sm:$0xff] %vm108_vm0, %v278_v48 }
  0xa5   :  { %v313_v49 = vpop.f32.mrf.mxu1 }
  0xa6   :  { %399 = vst.msk [vmem:[#allocation7 + $0x50] sm:$0xff] %vm108_vm0, %v313_v49 }
  0xa7   :  { %v348_v50 = vpop.f32.mrf.mxu2 }
  0xa8   :  { %401 = vst.msk [vmem:[#allocation7 + $0x60] sm:$0xff] %vm108_vm0, %v348_v50  ;;  %v383_v51 = vpop.f32.mrf.mxu3 }
  0xa9   :  { %403 = vst.msk [vmem:[#allocation7 + $0x70] sm:$0xff] %vm108_vm0, %v383_v51 }
  0xab   :  { %v281_v52 = vpop.f32.mrf.mxu0 }
  0xac   :  { %398 = vst.msk [vmem:[#allocation7 + $0x48] sm:$0xff] %vm108_vm0, %v281_v52 }
  0xad   :  { %v316_v53 = vpop.f32.mrf.mxu1 }
  0xae   :  { %400 = vst.msk [vmem:[#allocation7 + $0x58] sm:$0xff] %vm108_vm0, %v316_v53 }
  0xaf   :  { %v351_v54 = vpop.f32.mrf.mxu2 }
  0xb0   :  { %402 = vst.msk [vmem:[#allocation7 + $0x68] sm:$0xff] %vm108_vm0, %v351_v54  ;;  %v386_v55 = vpop.f32.mrf.mxu3 }
  0xb1   :  { %404 = vst.msk [vmem:[#allocation7 + $0x78] sm:$0xff] %vm108_vm0, %v386_v55 }
  0xb2   :  { %417 = dma.vmem_to_hbm [thread:$0]  %s410_s22, 2048, %s412_s25, [#allocation4], %s551_s17, %s551_s17, %s552_s18  }
  0xb3   :  { %548 = dma.done.wait [#allocation4], 2048  }
  0xb4   :  { %549 = vsyncadd [#allocation4], 4294965248 }
  0xb5   :  { %422 = vsyncpa [#allocation3], 1 }
  0xb6   :  { %423 = vsyncpa [#allocation6], 1 }
  0xb7   :  { %424 = vsyncpa [#allocation4], 1 }

</bundles_post_ra>
